<compile_context>
chip_gen: v7x
topology: tpu7x:2x2x1
jax: 0.10.0
libtpu: 0.0.40
codegen_flags: <defaults>
</compile_context>

<pallas_src>
import functools
import math

import jax
import jax.numpy as jnp
from jax.experimental import pallas as pl
from jax.experimental.pallas import tpu as pltpu


def _round_up(x, m):
    return ((x + m - 1) // m) * m


# --------------------------------------------------------------------------- #
# Kernel
# --------------------------------------------------------------------------- #
def _attn_kernel(hidden_ref, enc_ref, wq_ref, bq_ref, wkv_ref, bkv_ref,
                 att_ref, alpha_ref, *, kq_pad, v_pad, seq_len):
    tb = hidden_ref.shape[0]

    # --- Query projection (1/sqrt(kq) already folded into Wq/bq). ---
    query = (jnp.dot(hidden_ref[...].astype(jnp.bfloat16), wq_ref[...],
                     preferred_element_type=jnp.float32)
             + bq_ref[...])                                     # (tb, Kpad) f32

    # --- Fused K|V projection: ONE flattened 2-D MXU matmul. ---
    # enc is DMA'd as f32 and cast to bf16 in-register (no wrapper HBM pass).
    enc_bf = enc_ref[...].astype(jnp.bfloat16)                  # (tb*S, Dc)
    kv = (jnp.dot(enc_bf, wkv_ref[...],
                  preferred_element_type=jnp.float32)
          + bkv_ref[...])                                       # (tb*S, Kpad+Vpad) f32

    # 128-lane-aligned slices (free views), then reshape the small f32
    # intermediate per batch.  (The big enc tensor never gets reshaped.)
    key = kv[:, :kq_pad].reshape(tb, seq_len, kq_pad)           # (tb, S, Kpad)
    value = kv[:, kq_pad:].reshape(tb, seq_len, v_pad)          # (tb, S, Vpad)

    # --- Scores: degenerate batched matvec -> VPU mul + XLU lane reduce. ---
    # Pad lanes of query/key are exactly zero, so they contribute nothing.
    scores = jnp.sum(query[:, None, :] * key, axis=-1)          # (tb, S) f32

    # --- Numerically stable softmax over S (all f32). ---
    m = jnp.max(scores, axis=-1, keepdims=True)
    e = jnp.exp(scores - m)
    denom = jnp.sum(e, axis=-1, keepdims=True)
    # NOTE: approx reciprocal (EUP slot) -> alpha rows sum to 1 within ~2^-14.
    alpha = e * pl.reciprocal(denom, approx=True)               # (tb, S) f32

    # --- Attended value: VPU mul + sublane reduce over S. ---
    # TODO(synk): if a bundle dump shows the XLU as the binding slot for large
    # S, move this reduction onto the MXU via a batched dot_general instead.
    attended = jnp.sum(alpha[:, :, None] * value, axis=1)       # (tb, Vpad) f32

    # --- Lane-dense, 128-aligned writebacks (two outputs, each at lane 0). ---
    att_ref[...] = attended.astype(att_ref.dtype)
    s_pad = alpha_ref.shape[-1]
    pad = s_pad - seq_len
    if pad > 0:
        alpha_out = jnp.concatenate(
            [alpha, jnp.zeros((tb, pad), jnp.float32)], axis=-1)
    else:
        alpha_out = alpha
    alpha_ref[...] = alpha_out.astype(alpha_ref.dtype)


# --------------------------------------------------------------------------- #
# One-time parameter preparation (hoist out of the per-timestep decode loop)
# --------------------------------------------------------------------------- #
def prepare_params(params, kq_dim):
    """Fuse K|V weights, pad the kq/v split to 128-lane boundaries, fold the
    1/sqrt(kq) scale into the query projection, and pre-cast matmul weights to
    bf16.  Call ONCE per model, not per decode step."""
    wq, bq, wk, bk, wv, bv = params
    dq = wq.shape[0]
    dc = wk.shape[0]
    v_dim = wv.shape[1]
    kq_pad = _round_up(kq_dim, 128)
    v_pad = _round_up(v_dim, 128)
    scale = 1.0 / math.sqrt(kq_dim)

    wq_p = jnp.zeros((dq, kq_pad), jnp.float32).at[:, :kq_dim].set(wq * scale)
    bq_p = jnp.zeros((1, kq_pad), jnp.float32).at[:, :kq_dim].set(bq * scale)

    wkv = jnp.zeros((dc, kq_pad + v_pad), jnp.float32)
    wkv = wkv.at[:, :kq_dim].set(wk).at[:, kq_pad:kq_pad + v_dim].set(wv)
    bkv = jnp.zeros((1, kq_pad + v_pad), jnp.float32)
    bkv = bkv.at[:, :kq_dim].set(bk).at[:, kq_pad:kq_pad + v_dim].set(bv)

    return {
        "wq": wq_p.astype(jnp.bfloat16), "bq": bq_p,
        "wkv": wkv.astype(jnp.bfloat16), "bkv": bkv,
        "kq_dim": kq_dim, "kq_pad": kq_pad,
        "v_dim": v_dim, "v_pad": v_pad,
    }


# --------------------------------------------------------------------------- #
# VMEM-aware batch-tile selection
# --------------------------------------------------------------------------- #
def _pick_batch_tile(B, S, Dc, Dq, kq_pad, v_pad, s_pad, vmem_limit_bytes):
    def tile_bytes(tb):
        enc = tb * S * Dc * 4                     # f32 enc block
        hid = tb * max(Dq, 128) * 4               # hidden block (lane-padded)
        outs = tb * (v_pad + s_pad) * 4           # two lane-dense outputs
        # live f32 intermediates: kv + the largest broadcast product
        interm = tb * S * (kq_pad + v_pad) * 4 + tb * S * max(kq_pad, v_pad) * 4
        return 2 * (enc + hid + outs) + interm    # 2x = double buffering

    weights = ((Dq * kq_pad + Dc * (kq_pad + v_pad)) * 2      # bf16 weights
               + (kq_pad + (kq_pad + v_pad)) * 4)             # f32 biases
    budget = int(0.75 * vmem_limit_bytes) - 2 * weights

    divisors = [tb for tb in range(8, B + 1, 8) if B % tb == 0]
    if not divisors:
        return B                       # tiny / non-8-aligned batch: one full tile
    fitting = [tb for tb in divisors if tile_bytes(tb) <= budget]
    if not fitting:
        return divisors[0]             # smallest 8-aligned tile
    tb = max(fitting)
    if tb == B and len(fitting) > 1:
        tb = sorted(fitting)[-2]       # keep nb >= 2 so v7x megacore can split
    return tb


# --------------------------------------------------------------------------- #
# Wrapper
# --------------------------------------------------------------------------- #
def dot_product_attention(hidden, encoder_outputs, prepared):
    """hidden: (B, Dq) f32; encoder_outputs: (B, S, Dc) f32.
    Returns (attended (B, v_dim), alpha (B, S))."""
    B, Dq = hidden.shape
    _, S, Dc = encoder_outputs.shape
    kq_pad = prepared["kq_pad"]
    v_pad = prepared["v_pad"]
    v_dim = prepared["v_dim"]
    s_pad = _round_up(S, 128)

    # Flatten once in the wrapper (row-major view): plain 2-D DMA tiles.
    enc2d = encoder_outputs.reshape(B * S, Dc)

    vmem_limit = 32 << 20
    tb = _pick_batch_tile(B, S, Dc, Dq, kq_pad, v_pad, s_pad, vmem_limit)
    nb = B // tb

    kernel = functools.partial(_attn_kernel, kq_pad=kq_pad, v_pad=v_pad,
                               seq_len=S)

    grid_spec = pltpu.PrefetchScalarGridSpec(
        num_scalar_prefetch=0,
        grid=(nb,),
        in_specs=[
            pl.BlockSpec((tb, Dq), lambda i: (i, 0)),              # hidden tile (f32)
            pl.BlockSpec((tb * S, Dc), lambda i: (i, 0)),          # flat enc tile (f32)
            pl.BlockSpec((Dq, kq_pad), lambda i: (0, 0)),          # Wq  (VMEM-resident)
            pl.BlockSpec((1, kq_pad), lambda i: (0, 0)),           # bq
            pl.BlockSpec((Dc, kq_pad + v_pad), lambda i: (0, 0)),  # Wkv (VMEM-resident)
            pl.BlockSpec((1, kq_pad + v_pad), lambda i: (0, 0)),   # bkv
        ],
        out_specs=[
            pl.BlockSpec((tb, v_pad), lambda i: (i, 0)),           # attended (lane-dense)
            pl.BlockSpec((tb, s_pad), lambda i: (i, 0)),           # alpha    (lane-dense)
        ],
    )

    att_pad, alpha_pad = pl.pallas_call(
        kernel,
        out_shape=(jax.ShapeDtypeStruct((B, v_pad), jnp.float32),
                   jax.ShapeDtypeStruct((B, s_pad), jnp.float32)),
        grid_spec=grid_spec,
        compiler_params=pltpu.CompilerParams(
            dimension_semantics=("parallel",),
            vmem_limit_bytes=vmem_limit),
    )(hidden, enc2d, prepared["wq"], prepared["bq"],
      prepared["wkv"], prepared["bkv"])

    return att_pad[:, :v_dim], alpha_pad[:, :S]


# --------------------------------------------------------------------------- #
# Init + reference
# --------------------------------------------------------------------------- #
def init_params(key, q_input_dim, cand_input_dim, v_dim, kq_dim):
    """Deterministic PyTorch-Linear-style init; weights stored as (in, out)."""
    ks = jax.random.split(key, 6)

    def lin(kw, kb, fan_in, fan_out):
        bound = 1.0 / math.sqrt(fan_in)
        w = jax.random.uniform(kw, (fan_in, fan_out), jnp.float32, -bound, bound)
        b = jax.random.uniform(kb, (1, fan_out), jnp.float32, -bound, bound)
        return w, b

    wq, bq = lin(ks[0], ks[1], q_input_dim, kq_dim)
    wk, bk = lin(ks[2], ks[3], cand_input_dim, kq_dim)
    wv, bv = lin(ks[4], ks[5], cand_input_dim, v_dim)
    return (wq, bq, wk, bk, wv, bv)


def _reference(hidden, enc, params, kq_dim):
    wq, bq, wk, bk, wv, bv = params
    q = hidden @ wq + bq
    k = jnp.einsum('bsd,dk->bsk', enc, wk) + bk
    v = jnp.einsum('bsd,dv->bsv', enc, wv) + bv
    s = jnp.einsum('bk,bsk->bs', q, k) / math.sqrt(kq_dim)
    alpha = jax.nn.softmax(s, axis=-1)
    att = jnp.einsum('bs,bsv->bv', alpha, v)
    return att, alpha


if __name__ == "__main__":
    B, S = 2, 8
    q_input_dim, cand_input_dim, v_dim, kq_dim = 32, 32, 32, 64

    key = jax.random.PRNGKey(0)
    k_h, k_e, k_p = jax.random.split(key, 3)
    hidden = jax.random.normal(k_h, (B, q_input_dim), jnp.float32)
    encoder_outputs = jax.random.normal(k_e, (B, S, cand_input_dim), jnp.float32)
    params = init_params(k_p, q_input_dim, cand_input_dim, v_dim, kq_dim)

    # One-time weight preparation (hoisted out of any decode loop).
    prepared = prepare_params(params, kq_dim)

    attended, alpha = dot_product_attention(hidden, encoder_outputs, prepared)
    attended, alpha = jax.block_until_ready((attended, alpha))

    ref_att, ref_alpha = _reference(hidden, encoder_outputs, params, kq_dim)
    assert attended.shape == (B, v_dim) and alpha.shape == (B, S)
    # Tolerance loosened vs the f32 reference: bf16 matmul operands + approx
    # EUP reciprocal give ~1e-3..1e-2 relative agreement.
    assert jnp.allclose(attended, ref_att, atol=3e-2, rtol=3e-2)
    assert jnp.allclose(alpha, ref_alpha, atol=3e-2, rtol=3e-2)

    print("KERNEL_OK")
</pallas_src>

<mosaic_0001>
module attributes {stable_mosaic.version = 11 : i64} {
  func.func @_attn_kernel(%arg0: i32, %arg1: memref<2x32xf32, #tpu.memory_space<vmem>>, %arg2: memref<16x32xf32, #tpu.memory_space<vmem>>, %arg3: memref<32x128xbf16, #tpu.memory_space<vmem>>, %arg4: memref<1x128xf32, #tpu.memory_space<vmem>>, %arg5: memref<32x256xbf16, #tpu.memory_space<vmem>>, %arg6: memref<1x256xf32, #tpu.memory_space<vmem>>, %arg7: memref<2x128xf32, #tpu.memory_space<vmem>>, %arg8: memref<2x128xf32, #tpu.memory_space<vmem>>) attributes {dimension_semantics = [#tpu.dimension_semantics<parallel>], iteration_bounds = array<i64: 1>, scalar_prefetch = 0 : i64, scratch_operands = 0 : i64, tpu.core_type = #tpu.core_type<tc>, window_params = [{transform_indices = @transform_0, window_bounds = array<i64: 2, 32>}, {transform_indices = @transform_1, window_bounds = array<i64: 16, 32>}, {pipeline_mode = #tpu.pipeline_mode<synchronous>, transform_indices = @transform_2, window_bounds = array<i64: 32, 128>}, {pipeline_mode = #tpu.pipeline_mode<synchronous>, transform_indices = @transform_3, window_bounds = array<i64: 1, 128>}, {pipeline_mode = #tpu.pipeline_mode<synchronous>, transform_indices = @transform_4, window_bounds = array<i64: 32, 256>}, {pipeline_mode = #tpu.pipeline_mode<synchronous>, transform_indices = @transform_5, window_bounds = array<i64: 1, 256>}, {transform_indices = @transform_6, window_bounds = array<i64: 2, 128>}, {transform_indices = @transform_7, window_bounds = array<i64: 2, 128>}]} {
    %c0 = arith.constant 0 : index
    %c0_0 = arith.constant 0 : index
    %0 = vector.load %arg1[%c0, %c0_0] : memref<2x32xf32, #tpu.memory_space<vmem>>, vector<2x32xf32>
    %1 = arith.truncf %0 : vector<2x32xf32> to vector<2x32xbf16>
    %c0_1 = arith.constant 0 : index
    %c0_2 = arith.constant 0 : index
    %2 = vector.load %arg3[%c0_1, %c0_2] : memref<32x128xbf16, #tpu.memory_space<vmem>>, vector<32x128xbf16>
    %cst = arith.constant dense<0.000000e+00> : vector<2x128xf32>
    %3 = tpu.matmul %1, %2, %cst {dimension_numbers = #tpu.dot_dimension_numbers<[1], [0], [0], [1], [0, 0, 1, 1], [], []>} : vector<2x32xbf16>, vector<32x128xbf16>, vector<2x128xf32> -> vector<2x128xf32>
    %c0_3 = arith.constant 0 : index
    %c0_4 = arith.constant 0 : index
    %4 = vector.load %arg4[%c0_3, %c0_4] : memref<1x128xf32, #tpu.memory_space<vmem>>, vector<1x128xf32>
    %5 = vector.broadcast %4 : vector<1x128xf32> to vector<2x128xf32>
    %6 = arith.addf %3, %5 : vector<2x128xf32>
    %c0_5 = arith.constant 0 : index
    %c0_6 = arith.constant 0 : index
    %7 = vector.load %arg2[%c0_5, %c0_6] : memref<16x32xf32, #tpu.memory_space<vmem>>, vector<16x32xf32>
    %8 = arith.truncf %7 : vector<16x32xf32> to vector<16x32xbf16>
    %c0_7 = arith.constant 0 : index
    %c0_8 = arith.constant 0 : index
    %9 = vector.load %arg5[%c0_7, %c0_8] : memref<32x256xbf16, #tpu.memory_space<vmem>>, vector<32x256xbf16>
    %cst_9 = arith.constant dense<0.000000e+00> : vector<16x256xf32>
    %10 = tpu.matmul %8, %9, %cst_9 {dimension_numbers = #tpu.dot_dimension_numbers<[1], [0], [0], [1], [0, 0, 1, 1], [], []>} : vector<16x32xbf16>, vector<32x256xbf16>, vector<16x256xf32> -> vector<16x256xf32>
    %c0_10 = arith.constant 0 : index
    %c0_11 = arith.constant 0 : index
    %11 = vector.load %arg6[%c0_10, %c0_11] : memref<1x256xf32, #tpu.memory_space<vmem>>, vector<1x256xf32>
    %12 = vector.broadcast %11 : vector<1x256xf32> to vector<16x256xf32>
    %13 = arith.addf %10, %12 : vector<16x256xf32>
    %14 = vector.extract_strided_slice %13 {offsets = [0, 0], sizes = [16, 128], strides = [1, 1]} : vector<16x256xf32> to vector<16x128xf32>
    %15 = vector.shape_cast %14 : vector<16x128xf32> to vector<2x8x128xf32>
    %16 = vector.extract_strided_slice %13 {offsets = [0, 128], sizes = [16, 128], strides = [1, 1]} : vector<16x256xf32> to vector<16x128xf32>
    %17 = vector.shape_cast %16 : vector<16x128xf32> to vector<2x8x128xf32>
    %18 = vector.shape_cast %6 : vector<2x128xf32> to vector<2x1x128xf32>
    %19 = vector.broadcast %18 : vector<2x1x128xf32> to vector<2x8x128xf32>
    %20 = arith.mulf %19, %15 : vector<2x8x128xf32>
    %cst_12 = arith.constant dense<0.000000e+00> : vector<2x8xf32>
    %21 = vector.multi_reduction <add>, %20, %cst_12 [2] : vector<2x8x128xf32> to vector<2x8xf32>
    %cst_13 = arith.constant dense<0xFF800000> : vector<2xf32>
    %22 = vector.multi_reduction <maximumf>, %21, %cst_13 [1] : vector<2x8xf32> to vector<2xf32>
    %23 = vector.shape_cast %22 : vector<2xf32> to vector<2x1xf32>
    %24 = vector.broadcast %23 : vector<2x1xf32> to vector<2x8xf32>
    %25 = arith.subf %21, %24 : vector<2x8xf32>
    %26 = math.exp %25 : vector<2x8xf32>
    %cst_14 = arith.constant dense<0.000000e+00> : vector<2xf32>
    %27 = vector.multi_reduction <add>, %26, %cst_14 [1] : vector<2x8xf32> to vector<2xf32>
    %28 = vector.shape_cast %27 : vector<2xf32> to vector<2x1xf32>
    %29 = tpu.reciprocal %28 {approx = true} : vector<2x1xf32> -> vector<2x1xf32>
    %30 = vector.broadcast %29 : vector<2x1xf32> to vector<2x8xf32>
    %31 = arith.mulf %26, %30 : vector<2x8xf32>
    %32 = vector.shape_cast %31 : vector<2x8xf32> to vector<2x8x1xf32>
    %33 = vector.broadcast %32 : vector<2x8x1xf32> to vector<2x8x128xf32>
    %34 = arith.mulf %33, %17 : vector<2x8x128xf32>
    %cst_15 = arith.constant dense<0.000000e+00> : vector<2x128xf32>
    %35 = vector.multi_reduction <add>, %34, %cst_15 [1] : vector<2x8x128xf32> to vector<2x128xf32>
    %c0_16 = arith.constant 0 : index
    %c0_17 = arith.constant 0 : index
    %36 = vector.load %arg7[%c0_16, %c0_17] : memref<2x128xf32, #tpu.memory_space<vmem>>, vector<2x128xf32>
    tpu.vector_store %arg7[%c0_16, %c0_17], %35 {strides = array<i32>} : memref<2x128xf32, #tpu.memory_space<vmem>>, vector<2x128xf32>,
    %cst_18 = arith.constant 0.000000e+00 : f32
    %37 = vector.broadcast %cst_18 : f32 to vector<2x120xf32>
    %38 = tpu.concatenate %31, %37 in 1 : vector<2x8xf32>, vector<2x120xf32> -> vector<2x128xf32>
    %c0_19 = arith.constant 0 : index
    %c0_20 = arith.constant 0 : index
    %39 = vector.load %arg8[%c0_19, %c0_20] : memref<2x128xf32, #tpu.memory_space<vmem>>, vector<2x128xf32>
    tpu.vector_store %arg8[%c0_19, %c0_20], %38 {strides = array<i32>} : memref<2x128xf32, #tpu.memory_space<vmem>>, vector<2x128xf32>,
    return
  }
  func.func @transform_0(%arg0: i32) -> (i32, i32) {
    %c0_i32 = arith.constant 0 : i32
    %c0_i32_0 = arith.constant 0 : i32
    return %arg0, %c0_i32 : i32, i32
  }
  func.func @transform_1(%arg0: i32) -> (i32, i32) {
    %c0_i32 = arith.constant 0 : i32
    %c0_i32_0 = arith.constant 0 : i32
    return %arg0, %c0_i32 : i32, i32
  }
  func.func @transform_2(%arg0: i32) -> (i32, i32) {
    %c0_i32 = arith.constant 0 : i32
    %c0_i32_0 = arith.constant 0 : i32
    %c0_i32_1 = arith.constant 0 : i32
    return %c0_i32, %c0_i32_0 : i32, i32
  }
  func.func @transform_3(%arg0: i32) -> (i32, i32) {
    %c0_i32 = arith.constant 0 : i32
    %c0_i32_0 = arith.constant 0 : i32
    %c0_i32_1 = arith.constant 0 : i32
    return %c0_i32, %c0_i32_0 : i32, i32
  }
  func.func @transform_4(%arg0: i32) -> (i32, i32) {
    %c0_i32 = arith.constant 0 : i32
    %c0_i32_0 = arith.constant 0 : i32
    %c0_i32_1 = arith.constant 0 : i32
    return %c0_i32, %c0_i32_0 : i32, i32
  }
  func.func @transform_5(%arg0: i32) -> (i32, i32) {
    %c0_i32 = arith.constant 0 : i32
    %c0_i32_0 = arith.constant 0 : i32
    %c0_i32_1 = arith.constant 0 : i32
    return %c0_i32, %c0_i32_0 : i32, i32
  }
  func.func @transform_6(%arg0: i32) -> (i32, i32) {
    %c0_i32 = arith.constant 0 : i32
    %c0_i32_0 = arith.constant 0 : i32
    return %arg0, %c0_i32 : i32, i32
  }
  func.func @transform_7(%arg0: i32) -> (i32, i32) {
    %c0_i32 = arith.constant 0 : i32
    %c0_i32_0 = arith.constant 0 : i32
    return %arg0, %c0_i32 : i32, i32
  }
}

</mosaic_0001>

<bundles_post_ra>
// kernel: tpu_custom_call.1
= control target key start
LH: loop header
LB: loop body
LE: loop exit
PB: predicated region body
PF: predicated region fallthrough
CT: control target
= control target key end

     0   :  { %13 = vsyncpa [#allocation3], 0  ;;  %s767_s0 = inlined_call_operand.hbm [shape: f32[2,32], index: 0, kind: input, shape index: {}]   ;;  %s768_s1 = inlined_call_operand.hbm [shape: f32[16,32], index: 1, kind: input, shape index: {}]   ;;  %s769_s2 = inlined_call_operand.hbm [shape: bf16[32,128], index: 2, kind: input, shape index: {}]   ;;  %s770_s3 = inlined_call_operand.vmem [shape: f32[1,128], index: 3, kind: input, shape index: {}]   ;;  %s771_s4 = inlined_call_operand.hbm [shape: bf16[32,256], index: 4, kind: input, shape index: {}]   ;;  %s772_s5 = inlined_call_operand.vmem [shape: f32[1,256], index: 5, kind: input, shape index: {}]   ;;  %s773_s6 = inlined_call_operand.hbm [shape: f32[2,128], index: 6, kind: output, shape index: {0}]   ;;  %s774_s7 = inlined_call_operand.hbm [shape: f32[2,128], index: 7, kind: output, shape index: {1}]  }
   0x1   :  { %14 = vsyncpa [#allocation6], 0 }
   0x2   :  { %15 = vsyncpa [#allocation9], 0 }
   0x3   :  { %16 = vsyncpa [#allocation4], 0 }
   0x4   :  { %17 = vsyncpa [#allocation12], 0  ;;  %s610_s24 = smov [#allocation5]   ;;  %s468_s28 = scalar_lea.hbm %s768_s1, 256 }
   0x5   :  { %s33_s25 = sshll.u32 %s610_s24, 4  ;;  %p469_p0 = scmp.ne.s32.totalorder %s768_s1, %s468_s28  ;;  %s34_s25 = int_to_ptr.vmem [resolvable:$true] %s33_s25 }
   0x6   :  { %p472_p1 = scmp.lt.u32.totalorder %s468_s28, %s768_s1 }
   0x8   :  { %p474_p2 = pnand %p472_p1, %p469_p0 }
   0xa   :  { %477 = shalt.err (!%p474_p2)
}
   0xb   :  { %s478_s10 = scalar_lea.vmem %s34_s25, 256  ;;  %p483_p4 = scmp.lt.s32.totalorder %s34_s25, %s34_s25 }
   0xc   :  { %p479_p3 = scmp.ne.s32.totalorder %s34_s25, %s478_s10  ;;  %p484_p5 = scmp.lt.s32.totalorder %s478_s10, %s478_s10 }
   0xe   :  { %p485_p6 = por %p484_p5, %p483_p4 }
  0x10   :  { %p486_p7 = pnand %p485_p6, %p479_p3 }
  0x12   :  { %489 = shalt.err (!%p486_p7)
}
  0x13   :  { %s611_s11 = smov 128   ;;  %s612_s12 = smov 8  }
  0x14   :  { %39 = dma.hbm_to_vmem [thread:$0]  %s768_s1, 256, %s34_s25, [#allocation6], %s611_s11, %s611_s11, %s612_s12  }
  0x15   :  { %s613_s15 = smov [#allocation2]   ;;  %s614_s17 = smov [#allocation7]  }
  0x16   :  { %s24_s16 = sshll.u32 %s613_s15, 4  ;;  %s45_s18 = sshll.u32 %s614_s17, 4  ;;  %s25_s16 = int_to_ptr.vmem [resolvable:$true] %s24_s16  ;;  %s46_s18 = int_to_ptr.vmem [resolvable:$true] %s45_s18 }
  0x17   :  { %s490_s21 = scalar_lea.hbm %s767_s0, 32 }
  0x18   :  { %p491_p8 = scmp.ne.s32.totalorder %s767_s0, %s490_s21  ;;  %p494_p9 = scmp.lt.u32.totalorder %s490_s21, %s767_s0 }
  0x1a   :  { %p496_p10 = pnand %p494_p9, %p491_p8 }
  0x1c   :  { %499 = shalt.err (!%p496_p10)
}
  0x1d   :  { %s500_s1 = scalar_lea.vmem %s25_s16, 32  ;;  %p505_p12 = scmp.lt.s32.totalorder %s25_s16, %s25_s16 }
  0x1e   :  { %p501_p11 = scmp.ne.s32.totalorder %s25_s16, %s500_s1  ;;  %p506_p13 = scmp.lt.s32.totalorder %s500_s1, %s500_s1 }
  0x20   :  { %p507_p0 = por %p506_p13, %p505_p12 }
  0x22   :  { %p508_p1 = pnand %p507_p0, %p501_p11 }
  0x24   :  { %511 = shalt.err (!%p508_p1)
}
  0x25   :  { %27 = dma.hbm_to_vmem [thread:$0]  %s767_s0, 32, %s25_s16, [#allocation3]  }
  0x26   :  { %s512_s30 = scalar_lea.hbm %s769_s2, 256 }
  0x27   :  { %p513_p2 = scmp.ne.s32.totalorder %s769_s2, %s512_s30  ;;  %p516_p3 = scmp.lt.u32.totalorder %s512_s30, %s769_s2 }
  0x29   :  { %p518_p4 = pnand %p516_p3, %p513_p2 }
  0x2b   :  { %521 = shalt.err (!%p518_p4)
}
  0x2c   :  { %s522_s14 = scalar_lea.vmem %s46_s18, 256  ;;  %p527_p6 = scmp.lt.s32.totalorder %s46_s18, %s46_s18 }
  0x2d   :  { %p523_p5 = scmp.ne.s32.totalorder %s46_s18, %s522_s14  ;;  %p528_p7 = scmp.lt.s32.totalorder %s522_s14, %s522_s14 }
  0x2f   :  { %p529_p8 = por %p528_p7, %p527_p6 }
  0x31   :  { %p530_p9 = pnand %p529_p8, %p523_p5 }
  0x33   :  { %533 = shalt.err (!%p530_p9)
}
  0x34   :  { %s615_s0 = smov 64   ;;  %s616_s15 = smov 4  }
  0x35   :  { %51 = dma.hbm_to_vmem [thread:$0]  %s769_s2, 256, %s46_s18, [#allocation6], %s615_s0, %s615_s0, %s616_s15  }
  0x36   :  { %s617_s19 = smov [#allocation8]   ;;  %s534_s23 = scalar_lea.hbm %s771_s4, 512 }
  0x37   :  { %s59_s20 = sshll.u32 %s617_s19, 4  ;;  %p535_p10 = scmp.ne.s32.totalorder %s771_s4, %s534_s23  ;;  %s60_s20 = int_to_ptr.vmem [resolvable:$true] %s59_s20 }
  0x38   :  { %p538_p11 = scmp.lt.u32.totalorder %s534_s23, %s771_s4 }
  0x3a   :  { %p540_p12 = pnand %p538_p11, %p535_p10 }
  0x3c   :  { %543 = shalt.err (!%p540_p12)
}
  0x3d   :  { %s544_s27 = scalar_lea.vmem %s60_s20, 512  ;;  %p549_p0 = scmp.lt.s32.totalorder %s60_s20, %s60_s20 }
  0x3e   :  { %p545_p13 = scmp.ne.s32.totalorder %s60_s20, %s544_s27  ;;  %p550_p1 = scmp.lt.s32.totalorder %s544_s27, %s544_s27 }
  0x40   :  { %p551_p2 = por %p550_p1, %p549_p0 }
  0x42   :  { %p552_p3 = pnand %p551_p2, %p545_p13 }
  0x44   :  { %555 = shalt.err (!%p552_p3)
}
  0x45   :  { %65 = dma.hbm_to_vmem [thread:$0]  %s771_s4, 512, %s60_s20, [#allocation9], %s611_s11, %s611_s11, %s612_s12  }
  0x46   :  { %600 = dma.done.wait [#allocation3], 32  }
  0x47   :  { %601 = vsyncadd [#allocation3], 4294967264 }
  0x48   :  { %602 = dma.done.wait [#allocation6], 512  }
  0x49   :  { %603 = vsyncadd [#allocation6], 4294966784 }
  0x4a   :  { %604 = dma.done.wait [#allocation9], 512  }
  0x4b   :  { %605 = vsyncadd [#allocation9], 4294966784  ;;  %v618_v0 = vmov 0.0   ;;  %vm619_vm0 = vmmov 0   ;;  %v620_v1 = vmov 0   ;;  %v454_v2 = vld [vmem:[#allocation7] sm:$0xff]   ;;  %v159_v13 = vlaneseq }
  0x4c   :  { %430 = vmatprep.subr.bf16.mxu0 %v618_v0  ;;  %434 = vmatprep.mubr.msk.bf16.mxu0 %vm619_vm0, %v618_v0  ;;  %v455_v3 = vld [vmem:[#allocation8 + $0x4] ss:$8 sps:$4 sm:$0xff]   ;;  %v457_v4 = vld [vmem:[#allocation8] ss:$8 sps:$4 sm:$0xff]   ;;  %v458_v5 = vld [vmem:[#allocation7 + $0x8] sm:$0xff]   ;;  %vm106_vm1 = vcmask 261120  }
  0x4d   :  { %224 = vmatprep.mubr.bf16.mxu1 %v620_v1  ;;  %453 = vset.pattern.permute.xlu0 %v620_v1  ;;  %v459_v6 = vld [vmem:[#allocation8 + $0x14] ss:$8 sps:$4 sm:$0xff]   ;;  %v461_v8 = vld [vmem:[#allocation8 + $0x10] ss:$8 sps:$4 sm:$0xff]   ;;  %v150_v10 = vld [vmem:[#allocation5] sm:$0xff]  ;;  %v277_v14 = vand.u32 127, %v159_v13 }
  0x4e   :  { %452 = vset.pattern.permute.xlu1 %v620_v1  ;;  %431 = vmatpush3.bf16.msra.mxu0 %v454_v2  ;;  %v81_v7 = vld [vmem:[#allocation2] sm:$0x3]  ;;  %v151_v11 = vld [vmem:[#allocation5 + $0x8] sm:$0xff]  ;;  %v160_v15 = vshrl.u32 %v159_v13, 7  ;;  %v621_v17 = vmov 1966171168  }
  0x4f   :  { %192 = vmatprep.subr.bf16.mxu1 %v455_v3  ;;  %432 = vmatprep.subr.bf16.mxu0 %v618_v0  ;;  %v82_v9 = vpack.c.bf16 %v81_v7, %v81_v7  ;;  %v152_v12 = vpack.c.bf16 %v151_v11, %v150_v10  ;;  %v237_v18 = vunpack.c.l.s4 %v621_v17  ;;  %v157_v21 = vld [vmem:[%s772_s5] sm:$0x3]  ;;  %vm286_vm2 = vcmask 1041409  }
  0x50   :  { %193 = vmatpush1.bf16.msra.mxu1 %v457_v4  ;;  %v718_v16 = vsub.s32 %v277_v14, %v160_v15  ;;  %v720_v20 = vsub.s32 1, %v160_v15  ;;  %v161_v22 = vsub.s32 0, %v160_v15  ;;  %v418_v23 = vld [vmem:[%s770_s3] ss:$0 sm:$0xff]  ;;  %vm289_vm3 = vcmask 58368   ;;  %s622_s3 = smov [#allocation11]  }
  0x51   :  { %194 = vmatprep.subr.bf16.mxu1 %v459_v6  ;;  %v238_v19 = vunpack.c.0.s8 %v237_v18  ;;  %vm384_vm4 = vcmask 64512   ;;  %s403_s5 = sshll.u32 %s622_s3, 4  ;;  %s404_s5 = int_to_ptr.vmem [resolvable:$true] %s403_s5 }
  0x52   :  { %433 = vmatpush3.bf16.msra.mxu0 %v458_v5  ;;  %v166_v26 = vrot.slane %v157_v21, %v720_v20  ;;  %v162_v29 = vrot.slane %v157_v21, %v161_v22  ;;  %s556_s29 = scalar_lea.vmem %s404_s5, 32  ;;  %p561_p5 = scmp.lt.s32.totalorder %s404_s5, %s404_s5 }
  0x53   :  { %v241_v24 = vsub.s32 %v238_v19, %v160_v15  ;;  %p557_p4 = scmp.ne.s32.totalorder %s404_s5, %s556_s29  ;;  %p562_p6 = scmp.lt.s32.totalorder %s556_s29, %s556_s29 }
  0x54   :  { %195 = vmatpush1.bf16.msra.mxu1 %v461_v8 }
  0x55   :  { %435 = vmatmul.mubr.msk.bf16.vlgmr.msra.gmra.mrb[0].mxu0 %vm106_vm1, %v82_v9  ;;  %p563_p7 = por %p562_p6, %p561_p5 }
  0x57   :  { %426 = vmatmul.mubr.msk.bf16.vlgmr.msra.gmra.mrb[0].mxu1 %vm106_vm1, %v152_v12  ;;  %p564_p8 = pnand %p563_p7, %p557_p4 }
 0x128   :  { %v144_v25 = vpop.f32.mrb[0].mxu0 }
 0x129   :  { %v145_v27 = vadd.f32 %v418_v23, %v144_v25  ;;  %v436_v28 = vpop.f32.mrb[1].mxu0 }
 0x12a   :  { %v147_v30 = vpop.f32.mrb[2].mxu0  ;;  %v226_v31 = vpop.f32.mrb[0].mxu1 }
 0x12b   :  { %v242_v32 = vrot.slane %v145_v27, %v241_v24  ;;  %v437_v33 = vpop.f32.mrb[3].mxu0  ;;  %v228_v34 = vpop.f32.mrb[1].mxu1  ;;  %v227_v38 = vadd.f32 %v226_v31, %v162_v29 }
 0x12c   :  { %v229_v35 = vadd.f32 %v228_v34, %v166_v26  ;;  %v230_v36 = vpop.f32.mrb[2].mxu1 }
 0x12d   :  { %v243_v37 = vcombine.high %v242_v32, %v242_v32  ;;  %v232_v39 = vpop.f32.mrb[3].mxu1  ;;  %v250_v40 = vrot.slane %v242_v32, %v241_v24  ;;  %v231_v44 = vadd.f32 %v230_v36, %v162_v29 }
 0x12e   :  { %v233_v41 = vadd.f32 %v232_v39, %v166_v26 }
 0x12f   :  { %v261_v42 = vrot.slane %v250_v40, %v161_v22  ;;  %v257_v43 = vrot.slane %v243_v37, %v241_v24 }
 0x131   :  { %v268_v45 = vmul.f32 %v261_v42, %v227_v38  ;;  %v265_v46 = vrot.slane %v257_v43, %v161_v22 }
 0x133   :  { %270 = vadd.xlane.f32.xlu0 %v268_v45  ;;  %v269_v47 = vmul.f32 %v265_v46, %v231_v44 }
 0x137   :  { %272 = vadd.xlane.f32.xlu0 %v269_v47 }
 0x1c0   :  { %v271_v48 = vpop.xlane.xlu0 %270 }
 0x1c1   :  { %v281_v50 = vrot.slane %v271_v48, %v718_v16 }
 0x1c4   :  { %v273_v49 = vpop.xlane.xlu0 %272 }
 0x1c5   :  { %v285_v51 = vrot.slane %v273_v49, %v718_v16 }
 0x1c7   :  { %v287_v52 = vsel %vm286_vm2, %v285_v51, %v281_v50 }
 0x1c8   :  { %v290_v53 = vsel %vm289_vm3, %v287_v52, -inf }
 0x1c9   :  { %291 = vmax.xlane.f32.xlu1 %v290_v53 }
 0x256   :  { %v292_v54 = vpop.xlane.xlu1 %291 }
 0x257   :  { %v297_v55 = vrot.slane %v292_v54, %v161_v22  ;;  %v301_v56 = vrot.slane %v292_v54, %v720_v20 }
 0x259   :  { %v304_v57 = vsub.f32 %v271_v48, %v297_v55  ;;  %v305_v58 = vsub.f32 %v273_v49, %v301_v56 }
 0x25b   :  { %v306_v59 = vmul.f32 1.442695, %v304_v57  ;;  %v308_v60 = vmul.f32 1.442695, %v305_v58 }
 0x25d   :  { %462 = vpow2.f32 %v306_v59 }
 0x25e   :  { %464 = vpow2.f32 %v308_v60 }
 0x267   :  { %v463_v61 = vpop.eup %462 }
 0x268   :  { %v465_v62 = vpop.eup %464  ;;  %313 = vperm.xlu1 %452, %v463_v61  }
 0x269   :  { %316 = vperm.xlu0 %453, %v465_v62  }
 0x2e7   :  { %v314_v63 = vpop.permute.xlu1 %313 }
 0x2e8   :  { %v317_v0 = vpop.permute.xlu0 %316  ;;  %v321_v1 = vrot.slane %v314_v63, %v718_v16 }
 0x2e9   :  { %v325_v2 = vrot.slane %v317_v0, %v718_v16 }
 0x2eb   :  { %v326_v3 = vsel %vm286_vm2, %v325_v2, %v321_v1 }
 0x2ec   :  { %v328_v4 = vsel %vm289_vm3, %v326_v3, 0.0 }
 0x2ed   :  { %329 = vadd.xlane.f32.xlu1 %v328_v4 }
 0x37a   :  { %v330_v5 = vpop.xlane.xlu1 %329 }
 0x37b   :  { %466 = vrcp.f32 %v330_v5 }
 0x385   :  { %v467_v6 = vpop.eup %466 }
 0x386   :  { %v336_v7 = vrot.slane %v467_v6, %v161_v22  ;;  %v340_v9 = vrot.slane %v467_v6, %v720_v20 }
 0x388   :  { %v343_v8 = vmul.f32 %v463_v61, %v336_v7  ;;  %v344_v10 = vmul.f32 %v465_v62, %v340_v9 }
 0x38a   :  { %347 = vperm.xlu0 %453, %v343_v8  }
 0x38e   :  { %352 = vperm.xlu0 %453, %v344_v10  }
 0x409   :  { %v348_v11 = vpop.permute.xlu0 %347 }
 0x40a   :  { %v355_v12 = vmul.f32 %v348_v11, %v229_v35  ;;  %v377_v17 = vrot.slane %v348_v11, %v718_v16 }
 0x40c   :  { %v357_v13 = vrot.slane %v355_v12, 4 }
 0x40d   :  { %v353_v14 = vpop.permute.xlu0 %352 }
 0x40e   :  { %v358_v15 = vadd.f32 %v357_v13, %v355_v12  ;;  %v356_v18 = vmul.f32 %v353_v14, %v233_v41  ;;  %v381_v19 = vrot.slane %v353_v14, %v718_v16 }
 0x410   :  { %v359_v21 = vrot.slane %v358_v15, 2  ;;  %v363_v22 = vrot.slane %v356_v18, 4  ;;  %v382_v20 = vsel %vm286_vm2, %v381_v19, %v377_v17 }
 0x411   :  { %v385_v23 = vsel %vm384_vm4, %v382_v20, 0.0 }
 0x412   :  { %v360_v24 = vadd.f32 %v359_v21, %v358_v15  ;;  %v364_v25 = vadd.f32 %v363_v22, %v356_v18  ;;  %386 = vst [vmem:[#allocation11] sm:$0x3] %v385_v23 }
 0x413   :  { %567 = shalt.err (!%p564_p8)
}
 0x414   :  { %s568_s9 = scalar_lea.hbm %s774_s7, 32 }
 0x415   :  { %p569_p9 = scmp.ne.s32.totalorder %s774_s7, %s568_s9  ;;  %p572_p10 = scmp.lt.u32.totalorder %s568_s9, %s774_s7 }
 0x417   :  { %p574_p11 = pnand %p572_p10, %p569_p9 }
 0x419   :  { %577 = shalt.err (!%p574_p11)
}
 0x41a   :  { %406 = dma.vmem_to_hbm [thread:$0]  %s404_s5, 32, %s774_s7, [#allocation12]   ;;  %v365_v16 = vrot.slane %v364_v25, 2  ;;  %v361_v26 = vrot.slane %v360_v24, 1 }
 0x41b   :  { %s623_s17 = smov [#allocation10]  }
 0x41c   :  { %v366_v27 = vadd.f32 %v365_v16, %v364_v25  ;;  %s393_s19 = sshll.u32 %s623_s17, 4  ;;  %v362_v30 = vadd.f32 %v361_v26, %v360_v24  ;;  %s394_s19 = int_to_ptr.vmem [resolvable:$true] %s393_s19 }
 0x41d   :  { %s578_s20 = scalar_lea.vmem %s394_s19, 32  ;;  %p583_p13 = scmp.lt.s32.totalorder %s394_s19, %s394_s19 }
 0x41e   :  { %v367_v28 = vrot.slane %v366_v27, 1  ;;  %p579_p12 = scmp.ne.s32.totalorder %s394_s19, %s578_s20  ;;  %p584_p0 = scmp.lt.s32.totalorder %s578_s20, %s578_s20 }
 0x420   :  { %v368_v29 = vadd.f32 %v367_v28, %v366_v27  ;;  %p585_p1 = por %p584_p0, %p583_p13 }
 0x422   :  { %v371_v31 = vsel %vm286_vm2, %v368_v29, %v362_v30  ;;  %p586_p2 = pnand %p585_p1, %p579_p12 }
 0x423   :  { %373 = vst [vmem:[#allocation10] sm:$0x3] %v371_v31 }
 0x424   :  { %589 = shalt.err (!%p586_p2)
}
 0x425   :  { %s590_s22 = scalar_lea.hbm %s773_s6, 32 }
 0x426   :  { %p591_p3 = scmp.ne.s32.totalorder %s773_s6, %s590_s22  ;;  %p594_p4 = scmp.lt.u32.totalorder %s590_s22, %s773_s6 }
 0x428   :  { %p596_p5 = pnand %p594_p4, %p591_p3 }
 0x42a   :  { %599 = shalt.err (!%p596_p5)
}
 0x42b   :  { %396 = dma.vmem_to_hbm [thread:$0]  %s394_s19, 32, %s773_s6, [#allocation4]  }
 0x42c   :  { %606 = dma.done.wait [#allocation4], 32  }
 0x42d   :  { %607 = vsyncadd [#allocation4], 4294967264 }
 0x42e   :  { %608 = dma.done.wait [#allocation12], 32  }
 0x42f   :  { %609 = vsyncadd [#allocation12], 4294967264 }
 0x430   :  { %413 = vsyncpa [#allocation3], 1 }
 0x431   :  { %414 = vsyncpa [#allocation6], 1 }
 0x432   :  { %415 = vsyncpa [#allocation9], 1 }
 0x433   :  { %416 = vsyncpa [#allocation4], 1 }
 0x434   :  { %417 = vsyncpa [#allocation12], 1 }

</bundles_post_ra>
